<compile_context>
chip_gen: v5e
topology: v5e:2x2
jax: 0.10.0
libtpu: 0.0.40
codegen_flags: <defaults>
</compile_context>

<pallas_src>
import math

import numpy as np
import jax
import jax.numpy as jnp
from jax.experimental import pallas as pl
from jax.experimental.pallas import tpu as pltpu


def _round_up(x: int, m: int) -> int:
    return ((x + m - 1) // m) * m


def _edge_mul_simple_kernel(pot_ref, h_ref, out_ref):
    # pot_ref: (T, 1)   one scalar per row
    # h_ref  : (T, D)   one edge per row
    pot = pot_ref[...].astype(jnp.float32)
    h = h_ref[...].astype(jnp.float32)
    out_ref[...] = (pot * h).astype(out_ref.dtype)


def _edge_mul_packed_kernel(pot_ref, expand_ref, h_ref, out_ref):
    # pot_ref   : (T, pack)        `pack` per-edge scalars per packed row
    # expand_ref: (pack, lanes)    constant 0/1 expansion matrix (resident)
    # h_ref     : (T, lanes)       `pack` edges' D-dim features along lanes
    pot = pot_ref[...].astype(jnp.float32)
    # Scalar -> lane-segment broadcast on the MXU (exact: 0/1 weights).
    pot_full = jnp.dot(pot, expand_ref[...], preferred_element_type=jnp.float32)
    out_ref[...] = (pot_full * h_ref[...].astype(jnp.float32)).astype(out_ref.dtype)


def edge_distances_passing(potential, h_l_per_edge, *,
                           target_block_bytes=2 * 1024 * 1024,
                           max_packed_lanes=1024):
    """potential: (E,), h_l_per_edge: (E, D) -> (E, D) = potential[:, None] * h."""
    E, D = h_l_per_edge.shape
    out_dtype = jnp.result_type(potential.dtype, h_l_per_edge.dtype)

    # --- choose lane packing so the output last dim is lane-dense ---
    if D % 128 == 0:
        pack = 1                               # already lane-dense
    else:
        p = 128 // math.gcd(D, 128)            # smallest pack with pack*D % 128 == 0
        pack = p if p * D <= max_packed_lanes else 1
    lanes = pack * D

    # --- choose row tile (~target_block_bytes per h/out block) ---
    itemsize = max(jnp.dtype(h_l_per_edge.dtype).itemsize,
                   jnp.dtype(out_dtype).itemsize)
    bytes_per_row = lanes * itemsize
    tile_rows = max(8, (target_block_bytes // bytes_per_row) // 8 * 8)

    rows = -(-E // pack)                       # packed row count
    tile_rows = min(tile_rows, _round_up(rows, 8))
    rows_padded = _round_up(rows, tile_rows)
    e_padded = rows_padded * pack
    grid = (rows_padded // tile_rows,)

    # --- pad to the tiled extent (zeros; sliced off below) ---
    if e_padded != E:
        potential_p = jnp.pad(potential, (0, e_padded - E))
        h_p = jnp.pad(h_l_per_edge, ((0, e_padded - E), (0, 0)))
    else:
        potential_p, h_p = potential, h_l_per_edge

    pot2d = potential_p.reshape(rows_padded, pack)   # keep original dtype
    h2d = h_p.reshape(rows_padded, lanes)            # contiguous, free reshape

    # --- VMEM budget: double-buffered h in + out (+ tiny pot / expand) ---
    block_bytes = tile_rows * lanes * 4
    vmem_limit = int(min(64 * 1024 * 1024,
                         max(32 * 1024 * 1024, 6 * block_bytes + (2 << 20))))
    compiler_params = pltpu.CompilerParams(
        dimension_semantics=("parallel",),
        vmem_limit_bytes=vmem_limit,
    )

    if pack == 1:
        out_packed = pl.pallas_call(
            _edge_mul_simple_kernel,
            out_shape=jax.ShapeDtypeStruct((rows_padded, lanes), out_dtype),
            grid_spec=pltpu.PrefetchScalarGridSpec(
                num_scalar_prefetch=0,
                grid=grid,
                in_specs=[
                    pl.BlockSpec((tile_rows, 1), lambda i: (i, 0)),
                    pl.BlockSpec((tile_rows, lanes), lambda i: (i, 0)),
                ],
                out_specs=pl.BlockSpec((tile_rows, lanes), lambda i: (i, 0)),
            ),
            compiler_params=compiler_params,
        )(pot2d, h2d)
    else:
        # Constant 0/1 expansion matrix: expand[i, j] = 1 iff j // D == i.
        # Constant block index => DMA'd once, stays resident in VMEM.
        row = np.arange(pack).reshape(pack, 1)
        col = np.arange(lanes).reshape(1, lanes)
        expand = jnp.asarray((col // D) == row, dtype=jnp.float32)

        out_packed = pl.pallas_call(
            _edge_mul_packed_kernel,
            out_shape=jax.ShapeDtypeStruct((rows_padded, lanes), out_dtype),
            grid_spec=pltpu.PrefetchScalarGridSpec(
                num_scalar_prefetch=0,
                grid=grid,
                in_specs=[
                    pl.BlockSpec((tile_rows, pack), lambda i: (i, 0)),
                    pl.BlockSpec((pack, lanes), lambda i: (0, 0)),
                    pl.BlockSpec((tile_rows, lanes), lambda i: (i, 0)),
                ],
                out_specs=pl.BlockSpec((tile_rows, lanes), lambda i: (i, 0)),
            ),
            compiler_params=compiler_params,
        )(pot2d, expand, h2d)

    return out_packed.reshape(e_padded, D)[:E]


def _check_case(key, N, D, E):
    k1, k2, k3 = jax.random.split(key, 3)
    node_h_l = jax.random.normal(k1, (N, D), dtype=jnp.float32)
    src_ids = jax.random.randint(k2, (E,), 0, N)
    potential = jax.random.normal(k3, (E,), dtype=jnp.float32)

    # DGL runtime glue: materialize edges.src['h_l'] (gather of source nodes).
    # TODO(synk): fuse this gather into the kernel to halve HBM traffic.
    h_l_per_edge = jnp.take(node_h_l, src_ids, axis=0)

    feat_dist = edge_distances_passing(potential, h_l_per_edge)
    feat_dist = jax.block_until_ready(feat_dist)

    ref = potential.reshape(-1, 1) * h_l_per_edge
    assert feat_dist.shape == (E, D)
    assert feat_dist.dtype == ref.dtype
    assert jnp.allclose(feat_dist, ref, atol=1e-6, rtol=1e-6)


if __name__ == "__main__":
    key = jax.random.PRNGKey(0)
    ka, kb = jax.random.split(key, 2)

    # Primary case: D=32 -> pack=4, lane-dense MXU-broadcast path.
    # E deliberately NOT a multiple of the tile/pack to exercise padding.
    _check_case(ka, N=8, D=32, E=200)

    # Fallback case: D=100 (pack would be too wide) -> simple pack=1 path.
    _check_case(kb, N=8, D=100, E=37)

    print("KERNEL_OK")
</pallas_src>

<mosaic_0001>
module attributes {stable_mosaic.version = 11 : i64} {
  func.func @_edge_mul_packed_kernel(%arg0: i32, %arg1: memref<56x4xf32, #tpu.memory_space<vmem>>, %arg2: memref<4x128xf32, #tpu.memory_space<vmem>>, %arg3: memref<56x128xf32, #tpu.memory_space<vmem>>, %arg4: memref<56x128xf32, #tpu.memory_space<vmem>>) attributes {dimension_semantics = [#tpu.dimension_semantics<parallel>], iteration_bounds = array<i64: 1>, scalar_prefetch = 0 : i64, scratch_operands = 0 : i64, tpu.core_type = #tpu.core_type<tc>, window_params = [{transform_indices = @transform_0, window_bounds = array<i64: 56, 4>}, {pipeline_mode = #tpu.pipeline_mode<synchronous>, transform_indices = @transform_1, window_bounds = array<i64: 4, 128>}, {transform_indices = @transform_2, window_bounds = array<i64: 56, 128>}, {transform_indices = @transform_3, window_bounds = array<i64: 56, 128>}]} {
    %c0 = arith.constant 0 : index
    %c0_0 = arith.constant 0 : index
    %0 = vector.load %arg1[%c0, %c0_0] : memref<56x4xf32, #tpu.memory_space<vmem>>, vector<56x4xf32>
    %c0_1 = arith.constant 0 : index
    %c0_2 = arith.constant 0 : index
    %1 = vector.load %arg2[%c0_1, %c0_2] : memref<4x128xf32, #tpu.memory_space<vmem>>, vector<4x128xf32>
    %cst = arith.constant dense<0.000000e+00> : vector<56x128xf32>
    %2 = tpu.matmul %0, %1, %cst {dimension_numbers = #tpu.dot_dimension_numbers<[1], [0], [0], [1], [0, 0, 1, 1], [], []>} : vector<56x4xf32>, vector<4x128xf32>, vector<56x128xf32> -> vector<56x128xf32>
    %c0_3 = arith.constant 0 : index
    %c0_4 = arith.constant 0 : index
    %3 = vector.load %arg3[%c0_3, %c0_4] : memref<56x128xf32, #tpu.memory_space<vmem>>, vector<56x128xf32>
    %4 = arith.mulf %2, %3 : vector<56x128xf32>
    %c0_5 = arith.constant 0 : index
    %c0_6 = arith.constant 0 : index
    %5 = vector.load %arg4[%c0_5, %c0_6] : memref<56x128xf32, #tpu.memory_space<vmem>>, vector<56x128xf32>
    tpu.vector_store %arg4[%c0_5, %c0_6], %4 {strides = array<i32>} : memref<56x128xf32, #tpu.memory_space<vmem>>, vector<56x128xf32>,
    return
  }
  func.func @transform_0(%arg0: i32) -> (i32, i32) {
    %c0_i32 = arith.constant 0 : i32
    %c0_i32_0 = arith.constant 0 : i32
    return %arg0, %c0_i32 : i32, i32
  }
  func.func @transform_1(%arg0: i32) -> (i32, i32) {
    %c0_i32 = arith.constant 0 : i32
    %c0_i32_0 = arith.constant 0 : i32
    %c0_i32_1 = arith.constant 0 : i32
    return %c0_i32, %c0_i32_0 : i32, i32
  }
  func.func @transform_2(%arg0: i32) -> (i32, i32) {
    %c0_i32 = arith.constant 0 : i32
    %c0_i32_0 = arith.constant 0 : i32
    return %arg0, %c0_i32 : i32, i32
  }
  func.func @transform_3(%arg0: i32) -> (i32, i32) {
    %c0_i32 = arith.constant 0 : i32
    %c0_i32_0 = arith.constant 0 : i32
    return %arg0, %c0_i32 : i32, i32
  }
}

</mosaic_0001>

<bundles_post_ra>
// kernel: tpu_custom_call.1
= control target key start
LH: loop header
LB: loop body
LE: loop exit
PB: predicated region body
PF: predicated region fallthrough
CT: control target
= control target key end

     0   :  { %vm45_vm0 = vcmask 1043456   ;;  %vm23_vm1 = vcmask 31744   ;;  %s244_s0 = inlined_call_operand.vmem [shape: f32[56,4], index: 0, kind: input, shape index: {}]   ;;  %s245_s1 = inlined_call_operand.vmem [shape: f32[4,128], index: 1, kind: input, shape index: {}]   ;;  %s246_s2 = inlined_call_operand.vmem [shape: f32[56,128], index: 2, kind: input, shape index: {}]   ;;  %s247_s3 = inlined_call_operand.hbm [shape: f32[56,128], index: 3, kind: output, shape index: {}]  }
   0x1   :  { %v22_v0 = vld [vmem:[%s245_s1] sm:$0xf]  ;;  %v20_v1 = vld [vmem:[%s244_s0 + $0x28] sm:$0xff]  ;;  %v17_v3 = vld [vmem:[%s244_s0 + $0x10] sm:$0xff] }
   0x2   :  { %v15_v2 = vld [vmem:[%s244_s0] sm:$0xff]  ;;  %136 = vmatpush.msk.msra.mxu3 %vm45_vm0, %v22_v0  ;;  %126 = vmatpush.msk.msra.mxu0 %vm45_vm0, %v22_v0 }
   0x3   :  { %132 = vmatmul.msk.f32.vlgmr.msra.gmra.mxu3 %vm23_vm1, %v20_v1  ;;  %134 = vmatpush.msk.msra.mxu1 %vm45_vm0, %v22_v0  ;;  %v19_v4 = vld [vmem:[%s244_s0 + $0x20] sm:$0xff] }
   0x4   :  { %8 = vsyncpa [#allocation3], 0  ;;  %127 = vmatmul.msk.f32.vlgmr.msra.gmra.mxu0 %vm23_vm1, %v15_v2  ;;  %129 = vmatmul.msk.f32.vlgmr.msra.gmra.mxu1 %vm23_vm1, %v17_v3  ;;  %v21_v5 = vld [vmem:[%s244_s0 + $0x30] sm:$0xff]  ;;  %v16_v6 = vld [vmem:[%s244_s0 + $0x8] sm:$0xff]  ;;  %s166_s11 = smov [#allocation2]   ;;  %s114_s15 = sshll.u32 %s247_s3, 4  ;;  %s115_s15 = int_to_ptr.hbm [resolvable:$true] %s114_s15 }
   0x5   :  { %135 = vmatpush.msk.msra.mxu2 %vm45_vm0, %v22_v0  ;;  %v18_v7 = vld [vmem:[%s244_s0 + $0x18] sm:$0xff]  ;;  %v87_v8 = vld [vmem:[%s246_s2] sm:$0xff]  ;;  %v89_v9 = vld [vmem:[%s246_s2 + $0x10] sm:$0xff]  ;;  %s112_s12 = sshll.u32 %s166_s11, 4  ;;  %s167_s18 = smov 128   ;;  %s113_s12 = int_to_ptr.vmem [resolvable:$true] %s112_s12 }
   0x6   :  { %131 = vmatmul.msk.f32.vlgmr.msra.gmra.mxu2 %vm23_vm1, %v19_v4  ;;  %v92_v14 = vld [vmem:[%s246_s2 + $0x28] sm:$0xff]  ;;  %v90_v18 = vld [vmem:[%s246_s2 + $0x18] sm:$0xff]  ;;  %v91_v19 = vld [vmem:[%s246_s2 + $0x20] sm:$0xff]  ;;  %s168_s19 = smov 8  }
   0x7   :  { %v88_v17 = vld [vmem:[%s246_s2 + $0x8] sm:$0xff]  ;;  %v93_v26 = vld [vmem:[%s246_s2 + $0x30] sm:$0xff] }
   0xb   :  { %133 = vmatmul.msk.f32.gmra.mxu3 %vm23_vm1, %v21_v5 }
   0xc   :  { %128 = vmatmul.msk.f32.gmra.mxu0 %vm23_vm1, %v16_v6  ;;  %130 = vmatmul.msk.f32.gmra.mxu1 %vm23_vm1, %v18_v7 }
  0x81   :  { %v66_v10 = vpop.f32.mrf.mxu0  ;;  %v72_v11 = vpop.f32.mrf.mxu1 }
  0x82   :  { %v94_v12 = vmul.f32 %v87_v8, %v66_v10  ;;  %v96_v13 = vmul.f32 %v89_v9, %v72_v11 }
  0x84   :  { %101 = vst [vmem:[#allocation2] sm:$0xff] %v94_v12 }
  0x85   :  { %103 = vst [vmem:[#allocation2 + $0x10] sm:$0xff] %v96_v13 }
  0x86   :  { %v81_v15 = vpop.f32.mrf.mxu3 }
  0x87   :  { %v99_v16 = vmul.f32 %v92_v14, %v81_v15 }
  0x89   :  { %106 = vst [vmem:[#allocation2 + $0x28] sm:$0xff] %v99_v16  ;;  %v69_v20 = vpop.f32.mrf.mxu0  ;;  %v75_v21 = vpop.f32.mrf.mxu1 }
  0x8a   :  { %v95_v22 = vmul.f32 %v88_v17, %v69_v20  ;;  %v97_v23 = vmul.f32 %v90_v18, %v75_v21  ;;  %v78_v24 = vpop.f32.mrf.mxu2 }
  0x8b   :  { %v98_v25 = vmul.f32 %v91_v19, %v78_v24 }
  0x8c   :  { %102 = vst [vmem:[#allocation2 + $0x8] sm:$0xff] %v95_v22 }
  0x8d   :  { %104 = vst [vmem:[#allocation2 + $0x18] sm:$0xff] %v97_v23 }
  0x8e   :  { %105 = vst [vmem:[#allocation2 + $0x20] sm:$0xff] %v98_v25  ;;  %v84_v27 = vpop.f32.mrf.mxu3 }
  0x8f   :  { %v100_v28 = vmul.f32 %v93_v26, %v84_v27 }
  0x91   :  { %107 = vst [vmem:[#allocation2 + $0x30] sm:$0xff] %v100_v28 }
  0x92   :  { %120 = dma.vmem_to_hbm [thread:$0]  %s113_s12, 896, %s115_s15, [#allocation3], %s167_s18, %s167_s18, %s168_s19  }
  0x93   :  { %164 = dma.done.wait [#allocation3], 896  }
  0x94   :  { %165 = vsyncadd [#allocation3], 4294966400 }
  0x95   :  { %125 = vsyncpa [#allocation3], 1 }

</bundles_post_ra>
